<compile_context>
chip_gen: v7x
topology: tpu7x:2x2x1
jax: 0.10.0
libtpu: 0.0.40
codegen_flags: <defaults>
</compile_context>

<pallas_src>
import functools

import jax
import jax.numpy as jnp
from jax.experimental import pallas as pl
from jax.experimental.pallas import tpu as pltpu


def _round_up(v, m):
    return ((v + m - 1) // m) * m


# --------------------------------------------------------------------------- #
# Kernel
# --------------------------------------------------------------------------- #
def _mlp_generator_kernel(x_ref,
                          w1_ref, b1_ref,
                          w2_ref, b2_ref,
                          w3_ref, b3_ref,
                          w4_ref, b4_ref,
                          o_ref):
    # f32 HBM -> bf16 operand cast in-kernel (VPU work hidden under the MXU).
    x = x_ref[...].astype(jnp.bfloat16)

    # layer 1: Linear + ReLU   (bf16 operands, f32 accumulate, f32 bias/ReLU)
    h = jnp.dot(x, w1_ref[...], preferred_element_type=jnp.float32) + b1_ref[...]
    h = jnp.maximum(h, 0.0).astype(jnp.bfloat16)

    # layer 2: Linear + ReLU
    h = jnp.dot(h, w2_ref[...], preferred_element_type=jnp.float32) + b2_ref[...]
    h = jnp.maximum(h, 0.0).astype(jnp.bfloat16)

    # layer 3: Linear + ReLU
    h = jnp.dot(h, w3_ref[...], preferred_element_type=jnp.float32) + b3_ref[...]
    h = jnp.maximum(h, 0.0).astype(jnp.bfloat16)

    # layer 4: Linear, no activation; stored at the true output width
    # (lane-dense 128-chunks + at most one masked tail).
    h = jnp.dot(h, w4_ref[...], preferred_element_type=jnp.float32) + b4_ref[...]
    o_ref[...] = h.astype(o_ref.dtype)


# --------------------------------------------------------------------------- #
# One-time parameter packing (hoisted out of the per-call path)
# --------------------------------------------------------------------------- #
def _pad2d(a, rows, cols, dtype):
    a = jnp.asarray(a)
    if a.ndim == 1:                      # tolerate PyTorch-style (out,) biases
        a = a[None, :]
    out = jnp.zeros((rows, cols), dtype)
    return out.at[: a.shape[0], : a.shape[1]].set(a.astype(dtype))


def prepare_params(params):
    """Pack params once: (in, out)-layout weights zero-padded to the lane-dense
    hidden width and cast to bf16; biases stay f32 (added in the f32
    accumulator).  The last layer keeps its true out-width so the kernel can
    store the output at true width."""
    din, dout = params["w1"].shape
    dout_p = _round_up(dout, 128)        # padded hidden width for layers 1-3
    return {
        "w1": _pad2d(params["w1"], din, dout_p, jnp.bfloat16),
        "w2": _pad2d(params["w2"], dout_p, dout_p, jnp.bfloat16),
        "w3": _pad2d(params["w3"], dout_p, dout_p, jnp.bfloat16),
        "w4": _pad2d(params["w4"], dout_p, dout, jnp.bfloat16),
        "b1": _pad2d(params["b1"], 1, dout_p, jnp.float32),
        "b2": _pad2d(params["b2"], 1, dout_p, jnp.float32),
        "b3": _pad2d(params["b3"], 1, dout_p, jnp.float32),
        "b4": _pad2d(params["b4"], 1, dout, jnp.float32),
    }


# --------------------------------------------------------------------------- #
# Forward (jitted; the pallas_call is the only per-step work)
# --------------------------------------------------------------------------- #
def _choose_tm(n_p):
    # ~8 grid steps (>=4 per TC on v7x keeps the x-load / out-store DMAs
    # pipelined) while keeping tiles >=256 rows to amortize the ~0.35us fixed
    # per-step overhead on v5e/v6e.  Sweep per device for the last few %.
    tm = _round_up(max(pl.cdiv(n_p, 8), 1), 256)
    tm = max(256, min(tm, 2048))
    return min(tm, n_p)


@functools.partial(jax.jit, static_argnames=("tm", "out_dtype"))
def mlp_generator_forward(x, packed, *, tm=None, out_dtype=jnp.float32):
    """x: [N, input_dim] float32.  packed: output of prepare_params()."""
    n, din = x.shape
    dout_p = packed["w1"].shape[1]
    dout = packed["w4"].shape[1]
    assert packed["w1"].shape[0] == din

    # Rows only need sublane (8) alignment; feature dims stay at true width.
    n_p = _round_up(n, 8)
    if n_p != n:
        x = jnp.pad(x, ((0, n_p - n), (0, 0)))

    if tm is None:
        tm = _choose_tm(n_p)
    else:
        tm = max(8, min(_round_up(tm, 8), n_p))
    grid = (pl.cdiv(n_p, tm),)

    # Resident (whole-grid) weights: single-buffer only when double-buffering
    # would threaten v7x's 64 MiB VMEM; otherwise keep Pallas defaults.
    w_bytes = sum(v.size * v.dtype.itemsize for v in packed.values())
    if w_bytes > 12 * 2 ** 20:
        resident = lambda shape: pl.BlockSpec(shape, lambda i: (0, 0),
                                              pipeline_mode=pl.Buffered(1))
        wbuf = 1
    else:
        resident = lambda shape: pl.BlockSpec(shape, lambda i: (0, 0))
        wbuf = 2
    # TODO(synk): for output_dim >~2k, tile the weight out-dim on a second
    # ("arbitrary") grid axis instead of keeping all four weights resident.

    out_isz = jnp.dtype(out_dtype).itemsize
    flops = 2 * n_p * (din * dout_p + 2 * dout_p * dout_p + dout_p * dout)
    bytes_accessed = n_p * din * 4 + w_bytes + n_p * dout * out_isz

    vmem_est = (2 * tm * din * 4 +           # x tiles (double-buffered, f32)
                2 * tm * dout * out_isz +    # out tiles
                wbuf * w_bytes +             # resident weights + biases
                4 * tm * dout_p * 4)         # live intermediates (f32 + bf16)
    vmem_limit = int(min(64 * 2 ** 20, max(32 * 2 ** 20, int(1.5 * vmem_est))))

    out = pl.pallas_call(
        _mlp_generator_kernel,
        out_shape=jax.ShapeDtypeStruct((n_p, dout), out_dtype),
        grid=grid,
        in_specs=[
            pl.BlockSpec((tm, din), lambda i: (i, 0)),       # x streamed (f32)
            resident((din, dout_p)),    resident((1, dout_p)),
            resident((dout_p, dout_p)), resident((1, dout_p)),
            resident((dout_p, dout_p)), resident((1, dout_p)),
            resident((dout_p, dout)),   resident((1, dout)),
        ],
        out_specs=pl.BlockSpec((tm, dout), lambda i: (i, 0)),
        compiler_params=pltpu.CompilerParams(
            dimension_semantics=("parallel",),   # shards rows over v7x's 2 TCs
            vmem_limit_bytes=vmem_limit),
        cost_estimate=pl.CostEstimate(flops=flops, transcendentals=0,
                                      bytes_accessed=bytes_accessed),
    )(x, packed["w1"], packed["b1"], packed["w2"], packed["b2"],
      packed["w3"], packed["b3"], packed["w4"], packed["b4"])

    return out if n_p == n else out[:n]


# --------------------------------------------------------------------------- #
# Synthetic params + references
# --------------------------------------------------------------------------- #
def init_params(key, input_dim, output_dim):
    """Deterministic synthetic params matching nn.Linear shapes.

    PyTorch stores weight as (out, in); we store the transpose (in, out) so
    the kernel does x @ W directly.  Biases kept as (1, out)."""
    ks = jax.random.split(key, 8)
    dims = [(input_dim, output_dim)] + [(output_dim, output_dim)] * 3
    params = {}
    for i, (din, dout) in enumerate(dims, start=1):
        bound = 1.0 / jnp.sqrt(jnp.float32(din))
        params[f"w{i}"] = jax.random.uniform(
            ks[2 * (i - 1)], (din, dout), jnp.float32, -bound, bound)
        params[f"b{i}"] = jax.random.uniform(
            ks[2 * (i - 1) + 1], (1, dout), jnp.float32, -bound, bound)
    return params


def mlp_generator_reference_f32(x, p):
    h = jax.nn.relu(x @ p["w1"] + p["b1"])
    h = jax.nn.relu(h @ p["w2"] + p["b2"])
    h = jax.nn.relu(h @ p["w3"] + p["b3"])
    return h @ p["w4"] + p["b4"]


def mlp_generator_reference_bf16(x, p):
    """Emulates the kernel arithmetic: bf16 matmul operands, f32 accumulation."""
    bf = jnp.bfloat16
    dot = lambda a, b: jnp.dot(a.astype(bf), b.astype(bf),
                               preferred_element_type=jnp.float32)
    h = jax.nn.relu(dot(x, p["w1"]) + p["b1"])
    h = jax.nn.relu(dot(h, p["w2"]) + p["b2"])
    h = jax.nn.relu(dot(h, p["w3"]) + p["b3"])
    return dot(h, p["w4"]) + p["b4"]


if __name__ == "__main__":
    key = jax.random.PRNGKey(0)
    k_x, k_p, k_x2, k_p2 = jax.random.split(key, 4)

    # Case 1: small shapes from the module spec (N=16, 32 -> 64).
    N, INPUT_DIM, OUTPUT_DIM = 16, 32, 64
    x = jax.random.normal(k_x, (N, INPUT_DIM), dtype=jnp.float32)
    params = init_params(k_p, INPUT_DIM, OUTPUT_DIM)
    packed = prepare_params(params)                   # one-time packing

    out = jax.block_until_ready(mlp_generator_forward(x, packed))
    assert out.shape == (N, OUTPUT_DIM) and out.dtype == jnp.float32
    ref_bf16 = mlp_generator_reference_bf16(x, params)
    ref_f32 = mlp_generator_reference_f32(x, params)
    assert jnp.allclose(out, ref_bf16, atol=2e-3, rtol=2e-3), "mismatch vs bf16 ref"
    assert jnp.allclose(out, ref_f32, atol=1e-1, rtol=1e-1), "mismatch vs f32 ref"

    # Optional bf16 output path (halves the dominant HBM store stream).
    out_bf = jax.block_until_ready(
        mlp_generator_forward(x, packed, out_dtype=jnp.bfloat16))
    assert out_bf.dtype == jnp.bfloat16
    assert jnp.allclose(out_bf.astype(jnp.float32), ref_bf16, atol=5e-2, rtol=2e-2)

    # Case 2: multi-step row grid + non-128-multiple feature widths (96 -> 160).
    N2, IN2, OUT2 = 1024, 96, 160
    x2 = jax.random.normal(k_x2, (N2, IN2), dtype=jnp.float32)
    params2 = init_params(k_p2, IN2, OUT2)
    packed2 = prepare_params(params2)
    out2 = jax.block_until_ready(mlp_generator_forward(x2, packed2, tm=256))
    assert out2.shape == (N2, OUT2)
    ref2 = mlp_generator_reference_bf16(x2, params2)
    assert jnp.allclose(out2, ref2, atol=2e-3, rtol=2e-3), "mismatch vs bf16 ref (case 2)"

    # Default adaptive tile choice on the same data.
    out3 = jax.block_until_ready(mlp_generator_forward(x2, packed2))
    assert jnp.allclose(out3, ref2, atol=2e-3, rtol=2e-3), "mismatch (adaptive tm)"

    print("KERNEL_OK")
</pallas_src>

<mosaic_0001>
module attributes {stable_mosaic.version = 11 : i64} {
  func.func @_mlp_generator_kernel(%arg0: i32, %arg1: memref<16x32xf32, #tpu.memory_space<vmem>>, %arg2: memref<32x128xbf16, #tpu.memory_space<vmem>>, %arg3: memref<1x128xf32, #tpu.memory_space<vmem>>, %arg4: memref<128x128xbf16, #tpu.memory_space<vmem>>, %arg5: memref<1x128xf32, #tpu.memory_space<vmem>>, %arg6: memref<128x128xbf16, #tpu.memory_space<vmem>>, %arg7: memref<1x128xf32, #tpu.memory_space<vmem>>, %arg8: memref<128x64xbf16, #tpu.memory_space<vmem>>, %arg9: memref<1x64xf32, #tpu.memory_space<vmem>>, %arg10: memref<16x64xf32, #tpu.memory_space<vmem>>) attributes {dimension_semantics = [#tpu.dimension_semantics<parallel>], iteration_bounds = array<i64: 1>, scalar_prefetch = 0 : i64, scratch_operands = 0 : i64, tpu.core_type = #tpu.core_type<tc>, window_params = [{transform_indices = @transform_0, window_bounds = array<i64: 16, 32>}, {pipeline_mode = #tpu.pipeline_mode<synchronous>, transform_indices = @transform_1, window_bounds = array<i64: 32, 128>}, {pipeline_mode = #tpu.pipeline_mode<synchronous>, transform_indices = @transform_2, window_bounds = array<i64: 1, 128>}, {pipeline_mode = #tpu.pipeline_mode<synchronous>, transform_indices = @transform_3, window_bounds = array<i64: 128, 128>}, {pipeline_mode = #tpu.pipeline_mode<synchronous>, transform_indices = @transform_4, window_bounds = array<i64: 1, 128>}, {pipeline_mode = #tpu.pipeline_mode<synchronous>, transform_indices = @transform_5, window_bounds = array<i64: 128, 128>}, {pipeline_mode = #tpu.pipeline_mode<synchronous>, transform_indices = @transform_6, window_bounds = array<i64: 1, 128>}, {pipeline_mode = #tpu.pipeline_mode<synchronous>, transform_indices = @transform_7, window_bounds = array<i64: 128, 64>}, {pipeline_mode = #tpu.pipeline_mode<synchronous>, transform_indices = @transform_8, window_bounds = array<i64: 1, 64>}, {transform_indices = @transform_9, window_bounds = array<i64: 16, 64>}]} {
    %c0 = arith.constant 0 : index
    %c0_0 = arith.constant 0 : index
    %0 = vector.load %arg1[%c0, %c0_0] : memref<16x32xf32, #tpu.memory_space<vmem>>, vector<16x32xf32>
    %1 = arith.truncf %0 : vector<16x32xf32> to vector<16x32xbf16>
    %c0_1 = arith.constant 0 : index
    %c0_2 = arith.constant 0 : index
    %2 = vector.load %arg2[%c0_1, %c0_2] : memref<32x128xbf16, #tpu.memory_space<vmem>>, vector<32x128xbf16>
    %cst = arith.constant dense<0.000000e+00> : vector<16x128xf32>
    %3 = tpu.matmul %1, %2, %cst {dimension_numbers = #tpu.dot_dimension_numbers<[1], [0], [0], [1], [0, 0, 1, 1], [], []>} : vector<16x32xbf16>, vector<32x128xbf16>, vector<16x128xf32> -> vector<16x128xf32>
    %c0_3 = arith.constant 0 : index
    %c0_4 = arith.constant 0 : index
    %4 = vector.load %arg3[%c0_3, %c0_4] : memref<1x128xf32, #tpu.memory_space<vmem>>, vector<1x128xf32>
    %5 = vector.broadcast %4 : vector<1x128xf32> to vector<16x128xf32>
    %6 = arith.addf %3, %5 : vector<16x128xf32>
    %cst_5 = arith.constant 0.000000e+00 : f32
    %7 = vector.broadcast %cst_5 : f32 to vector<16x128xf32>
    %8 = arith.maximumf %6, %7 : vector<16x128xf32>
    %9 = arith.truncf %8 : vector<16x128xf32> to vector<16x128xbf16>
    %c0_6 = arith.constant 0 : index
    %c0_7 = arith.constant 0 : index
    %10 = vector.load %arg4[%c0_6, %c0_7] : memref<128x128xbf16, #tpu.memory_space<vmem>>, vector<128x128xbf16>
    %cst_8 = arith.constant dense<0.000000e+00> : vector<16x128xf32>
    %11 = tpu.matmul %9, %10, %cst_8 {dimension_numbers = #tpu.dot_dimension_numbers<[1], [0], [0], [1], [0, 0, 1, 1], [], []>} : vector<16x128xbf16>, vector<128x128xbf16>, vector<16x128xf32> -> vector<16x128xf32>
    %c0_9 = arith.constant 0 : index
    %c0_10 = arith.constant 0 : index
    %12 = vector.load %arg5[%c0_9, %c0_10] : memref<1x128xf32, #tpu.memory_space<vmem>>, vector<1x128xf32>
    %13 = vector.broadcast %12 : vector<1x128xf32> to vector<16x128xf32>
    %14 = arith.addf %11, %13 : vector<16x128xf32>
    %cst_11 = arith.constant 0.000000e+00 : f32
    %15 = vector.broadcast %cst_11 : f32 to vector<16x128xf32>
    %16 = arith.maximumf %14, %15 : vector<16x128xf32>
    %17 = arith.truncf %16 : vector<16x128xf32> to vector<16x128xbf16>
    %c0_12 = arith.constant 0 : index
    %c0_13 = arith.constant 0 : index
    %18 = vector.load %arg6[%c0_12, %c0_13] : memref<128x128xbf16, #tpu.memory_space<vmem>>, vector<128x128xbf16>
    %cst_14 = arith.constant dense<0.000000e+00> : vector<16x128xf32>
    %19 = tpu.matmul %17, %18, %cst_14 {dimension_numbers = #tpu.dot_dimension_numbers<[1], [0], [0], [1], [0, 0, 1, 1], [], []>} : vector<16x128xbf16>, vector<128x128xbf16>, vector<16x128xf32> -> vector<16x128xf32>
    %c0_15 = arith.constant 0 : index
    %c0_16 = arith.constant 0 : index
    %20 = vector.load %arg7[%c0_15, %c0_16] : memref<1x128xf32, #tpu.memory_space<vmem>>, vector<1x128xf32>
    %21 = vector.broadcast %20 : vector<1x128xf32> to vector<16x128xf32>
    %22 = arith.addf %19, %21 : vector<16x128xf32>
    %cst_17 = arith.constant 0.000000e+00 : f32
    %23 = vector.broadcast %cst_17 : f32 to vector<16x128xf32>
    %24 = arith.maximumf %22, %23 : vector<16x128xf32>
    %25 = arith.truncf %24 : vector<16x128xf32> to vector<16x128xbf16>
    %c0_18 = arith.constant 0 : index
    %c0_19 = arith.constant 0 : index
    %26 = vector.load %arg8[%c0_18, %c0_19] : memref<128x64xbf16, #tpu.memory_space<vmem>>, vector<128x64xbf16>
    %cst_20 = arith.constant dense<0.000000e+00> : vector<16x64xf32>
    %27 = tpu.matmul %25, %26, %cst_20 {dimension_numbers = #tpu.dot_dimension_numbers<[1], [0], [0], [1], [0, 0, 1, 1], [], []>} : vector<16x128xbf16>, vector<128x64xbf16>, vector<16x64xf32> -> vector<16x64xf32>
    %c0_21 = arith.constant 0 : index
    %c0_22 = arith.constant 0 : index
    %28 = vector.load %arg9[%c0_21, %c0_22] : memref<1x64xf32, #tpu.memory_space<vmem>>, vector<1x64xf32>
    %29 = vector.broadcast %28 : vector<1x64xf32> to vector<16x64xf32>
    %30 = arith.addf %27, %29 : vector<16x64xf32>
    %c0_23 = arith.constant 0 : index
    %c0_24 = arith.constant 0 : index
    %31 = vector.load %arg10[%c0_23, %c0_24] : memref<16x64xf32, #tpu.memory_space<vmem>>, vector<16x64xf32>
    tpu.vector_store %arg10[%c0_23, %c0_24], %30 {strides = array<i32>} : memref<16x64xf32, #tpu.memory_space<vmem>>, vector<16x64xf32>,
    return
  }
  func.func @transform_0(%arg0: i32) -> (i32, i32) {
    %c0_i32 = arith.constant 0 : i32
    %c0_i32_0 = arith.constant 0 : i32
    return %arg0, %c0_i32 : i32, i32
  }
  func.func @transform_1(%arg0: i32) -> (i32, i32) {
    %c0_i32 = arith.constant 0 : i32
    %c0_i32_0 = arith.constant 0 : i32
    %c0_i32_1 = arith.constant 0 : i32
    return %c0_i32, %c0_i32_0 : i32, i32
  }
  func.func @transform_2(%arg0: i32) -> (i32, i32) {
    %c0_i32 = arith.constant 0 : i32
    %c0_i32_0 = arith.constant 0 : i32
    %c0_i32_1 = arith.constant 0 : i32
    return %c0_i32, %c0_i32_0 : i32, i32
  }
  func.func @transform_3(%arg0: i32) -> (i32, i32) {
    %c0_i32 = arith.constant 0 : i32
    %c0_i32_0 = arith.constant 0 : i32
    %c0_i32_1 = arith.constant 0 : i32
    return %c0_i32, %c0_i32_0 : i32, i32
  }
  func.func @transform_4(%arg0: i32) -> (i32, i32) {
    %c0_i32 = arith.constant 0 : i32
    %c0_i32_0 = arith.constant 0 : i32
    %c0_i32_1 = arith.constant 0 : i32
    return %c0_i32, %c0_i32_0 : i32, i32
  }
  func.func @transform_5(%arg0: i32) -> (i32, i32) {
    %c0_i32 = arith.constant 0 : i32
    %c0_i32_0 = arith.constant 0 : i32
    %c0_i32_1 = arith.constant 0 : i32
    return %c0_i32, %c0_i32_0 : i32, i32
  }
  func.func @transform_6(%arg0: i32) -> (i32, i32) {
    %c0_i32 = arith.constant 0 : i32
    %c0_i32_0 = arith.constant 0 : i32
    %c0_i32_1 = arith.constant 0 : i32
    return %c0_i32, %c0_i32_0 : i32, i32
  }
  func.func @transform_7(%arg0: i32) -> (i32, i32) {
    %c0_i32 = arith.constant 0 : i32
    %c0_i32_0 = arith.constant 0 : i32
    %c0_i32_1 = arith.constant 0 : i32
    return %c0_i32, %c0_i32_0 : i32, i32
  }
  func.func @transform_8(%arg0: i32) -> (i32, i32) {
    %c0_i32 = arith.constant 0 : i32
    %c0_i32_0 = arith.constant 0 : i32
    %c0_i32_1 = arith.constant 0 : i32
    return %c0_i32, %c0_i32_0 : i32, i32
  }
  func.func @transform_9(%arg0: i32) -> (i32, i32) {
    %c0_i32 = arith.constant 0 : i32
    %c0_i32_0 = arith.constant 0 : i32
    return %arg0, %c0_i32 : i32, i32
  }
}

</mosaic_0001>

<bundles_post_ra>
// kernel: mlp_generator_forward.1
= control target key start
LH: loop header
LB: loop body
LE: loop exit
PB: predicated region body
PF: predicated region fallthrough
CT: control target
= control target key end

     0   :  { %14 = vsyncpa [#allocation3], 0  ;;  %s883_s0 = inlined_call_operand.vmem [shape: f32[16,32], index: 0, kind: input, shape index: {}]   ;;  %s884_s1 = inlined_call_operand.vmem [shape: bf16[32,128], index: 1, kind: input, shape index: {}]   ;;  %s885_s2 = inlined_call_operand.vmem [shape: f32[1,128], index: 2, kind: input, shape index: {}]   ;;  %s886_s3 = inlined_call_operand.vmem [shape: bf16[128,128], index: 3, kind: input, shape index: {}]   ;;  %s887_s4 = inlined_call_operand.vmem [shape: f32[1,128], index: 4, kind: input, shape index: {}]   ;;  %s888_s5 = inlined_call_operand.hbm [shape: bf16[128,128], index: 5, kind: input, shape index: {}]   ;;  %s889_s6 = inlined_call_operand.vmem [shape: f32[1,128], index: 6, kind: input, shape index: {}]   ;;  %s890_s7 = inlined_call_operand.vmem [shape: bf16[128,64], index: 7, kind: input, shape index: {}]   ;;  %s891_s8 = inlined_call_operand.vmem [shape: f32[1,64], index: 8, kind: input, shape index: {}]   ;;  %s892_s9 = inlined_call_operand.hbm [shape: f32[16,64], index: 9, kind: output, shape index: {}]  }
   0x1   :  { %15 = vsyncpa [#allocation4], 0  ;;  %s695_s30 = smov [#allocation2]   ;;  %s647_s13 = scalar_lea.hbm %s888_s5, 1024 }
   0x2   :  { %s31_s10 = sshll.u32 %s695_s30, 4  ;;  %p648_p0 = scmp.ne.s32.totalorder %s888_s5, %s647_s13  ;;  %s32_s10 = int_to_ptr.vmem [resolvable:$true] %s31_s10 }
   0x3   :  { %p651_p1 = scmp.lt.u32.totalorder %s647_s13, %s888_s5 }
   0x5   :  { %p653_p2 = pnand %p651_p1, %p648_p0 }
   0x7   :  { %656 = shalt.err (!%p653_p2)
}
   0x8   :  { %s657_s18 = scalar_lea.vmem %s32_s10, 1024  ;;  %p662_p4 = scmp.lt.s32.totalorder %s32_s10, %s32_s10 }
   0x9   :  { %p658_p3 = scmp.ne.s32.totalorder %s32_s10, %s657_s18  ;;  %p663_p5 = scmp.lt.s32.totalorder %s657_s18, %s657_s18 }
   0xb   :  { %p664_p6 = por %p663_p5, %p662_p4 }
   0xd   :  { %p665_p7 = pnand %p664_p6, %p658_p3 }
   0xf   :  { %668 = shalt.err (!%p665_p7)
}
  0x10   :  { %s696_s19 = smov 64   ;;  %s697_s20 = smov 4  }
  0x11   :  { %37 = dma.hbm_to_vmem [thread:$0]  %s888_s5, 1024, %s32_s10, [#allocation3], %s696_s19, %s696_s19, %s697_s20  }
  0x12   :  { %691 = dma.done.wait [#allocation3], 1024  }
  0x13   :  { %692 = vsyncadd [#allocation3], 4294966272  ;;  %v698_v0 = vmov 0.0   ;;  %vm699_vm0 = vmmov 0   ;;  %v621_v1 = vld [vmem:[%s884_s1] sm:$0xff]   ;;  %v622_v2 = vld [vmem:[%s884_s1 + $0x8] sm:$0xff]  }
  0x14   :  { %545 = vmatprep.subr.bf16.mxu0 %v698_v0  ;;  %549 = vmatprep.mubr.msk.bf16.mxu0 %vm699_vm0, %v698_v0  ;;  %v48_v3 = vld [vmem:[%s883_s0] sm:$0xff]  ;;  %v49_v4 = vld [vmem:[%s883_s0 + $0x8] sm:$0xff]  ;;  %vm74_vm1 = vcmask 261120   ;;  %v625_v8 = vld [vmem:[%s886_s3 + $0x10] sm:$0xff]   ;;  %vm464_vm2 = vcmask 523264  }
  0x15   :  { %553 = vmatprep.subr.bf16.mxu1 %v698_v0  ;;  %569 = vmatprep.mubr.msk.bf16.mxu1 %vm699_vm0, %v698_v0  ;;  %v623_v5 = vld [vmem:[%s886_s3] sm:$0xff]   ;;  %v50_v6 = vpack.c.bf16 %v49_v4, %v48_v3  ;;  %v624_v7 = vld [vmem:[%s886_s3 + $0x8] sm:$0xff]   ;;  %v626_v9 = vld [vmem:[%s886_s3 + $0x18] sm:$0xff]  }
  0x16   :  { %546 = vmatpush3.bf16.msra.mxu0 %v621_v1  ;;  %554 = vmatpush3.bf16.msra.mxu1 %v623_v5  ;;  %v627_v10 = vld [vmem:[%s886_s3 + $0x20] sm:$0xff]   ;;  %v628_v11 = vld [vmem:[%s886_s3 + $0x28] sm:$0xff]   ;;  %v629_v12 = vld [vmem:[%s886_s3 + $0x30] sm:$0xff]  }
  0x17   :  { %547 = vmatprep.subr.bf16.mxu0 %v698_v0  ;;  %555 = vmatprep.subr.bf16.mxu1 %v698_v0  ;;  %v630_v13 = vld [vmem:[%s886_s3 + $0x38] sm:$0xff]   ;;  %v631_v14 = vld [vmem:[#allocation2] sm:$0xff]   ;;  %v632_v15 = vld [vmem:[#allocation2 + $0x8] sm:$0xff]  }
  0x18   :  { %v633_v16 = vld [vmem:[#allocation2 + $0x10] sm:$0xff]   ;;  %v634_v17 = vld [vmem:[#allocation2 + $0x18] sm:$0xff]   ;;  %v635_v18 = vld [vmem:[#allocation2 + $0x20] sm:$0xff]  }
  0x19   :  { %v636_v19 = vld [vmem:[#allocation2 + $0x28] sm:$0xff]   ;;  %v484_v20 = vld [vmem:[%s885_s2] ss:$0 sm:$0xff]  ;;  %v637_v30 = vld [vmem:[#allocation2 + $0x30] sm:$0xff]  }
  0x1a   :  { %548 = vmatpush3.bf16.msra.mxu0 %v622_v2  ;;  %556 = vmatpush3.bf16.msra.mxu1 %v624_v7  ;;  %v638_v31 = vld [vmem:[#allocation2 + $0x38] sm:$0xff]   ;;  %v639_v32 = vld [vmem:[%s890_s7] sm:$0xff]   ;;  %v640_v33 = vld [vmem:[%s890_s7 + $0x8] sm:$0xff]  }
  0x1b   :  { %573 = vmatprep.subr.bf16.mxu0 %v698_v0  ;;  %557 = vmatprep.subr.bf16.mxu1 %v698_v0  ;;  %v641_v34 = vld [vmem:[%s890_s7 + $0x10] sm:$0xff]   ;;  %v642_v35 = vld [vmem:[%s890_s7 + $0x18] sm:$0xff]   ;;  %v643_v36 = vld [vmem:[%s890_s7 + $0x20] sm:$0xff]  }
  0x1c   :  { %v644_v37 = vld [vmem:[%s890_s7 + $0x28] sm:$0xff]   ;;  %v488_v38 = vld [vmem:[%s887_s4] ss:$0 sm:$0xff]  ;;  %v645_v48 = vld [vmem:[%s890_s7 + $0x30] sm:$0xff]  }
  0x1d   :  { %550 = vmatmul.mubr.msk.bf16.vlgmr.msra.gmra.mrb[0].mxu0 %vm74_vm1, %v50_v6  ;;  %v646_v49 = vld [vmem:[%s890_s7 + $0x38] sm:$0xff]   ;;  %v497_v50 = vld [vmem:[%s889_s6] ss:$0 sm:$0xff]  ;;  %s700_s7 = smov [#allocation5]  }
  0x1e   :  { %589 = vmatprep.mubr.msk.bf16.mxu0 %vm699_vm0, %v698_v0  ;;  %558 = vmatpush3.bf16.msra.mxu1 %v625_v8  ;;  %v506_v60 = vld [vmem:[%s891_s8] ss:$0 sm:$0xff]  ;;  %s472_s20 = sshll.u32 %s700_s7, 4  ;;  %s473_s20 = int_to_ptr.vmem [resolvable:$true] %s472_s20 }
  0x1f   :  { %559 = vmatprep.subr.bf16.mxu1 %v698_v0  ;;  %574 = vmatpush3.bf16.msra.mxu0 %v631_v14  ;;  %s669_s6 = scalar_lea.vmem %s473_s20, 256  ;;  %p674_p9 = scmp.lt.s32.totalorder %s473_s20, %s473_s20 }
  0x20   :  { %575 = vmatprep.subr.bf16.mxu0 %v698_v0  ;;  %p670_p8 = scmp.ne.s32.totalorder %s473_s20, %s669_s6  ;;  %p675_p10 = scmp.lt.s32.totalorder %s669_s6, %s669_s6 }
  0x22   :  { %560 = vmatpush3.bf16.msra.mxu1 %v626_v9  ;;  %p676_p11 = por %p675_p10, %p674_p9 }
  0x23   :  { %561 = vmatprep.subr.bf16.mxu1 %v698_v0  ;;  %576 = vmatpush3.bf16.msra.mxu0 %v632_v15 }
  0x24   :  { %577 = vmatprep.subr.bf16.mxu0 %v698_v0  ;;  %p677_p12 = pnand %p676_p11, %p670_p8 }
  0x26   :  { %562 = vmatpush3.bf16.msra.mxu1 %v627_v10 }
  0x27   :  { %563 = vmatprep.subr.bf16.mxu1 %v698_v0  ;;  %578 = vmatpush3.bf16.msra.mxu0 %v633_v16 }
  0x28   :  { %579 = vmatprep.subr.bf16.mxu0 %v698_v0 }
  0x2a   :  { %564 = vmatpush3.bf16.msra.mxu1 %v628_v11 }
  0x2b   :  { %565 = vmatprep.subr.bf16.mxu1 %v698_v0  ;;  %580 = vmatpush3.bf16.msra.mxu0 %v634_v17 }
  0x2c   :  { %581 = vmatprep.subr.bf16.mxu0 %v698_v0 }
  0x2e   :  { %566 = vmatpush3.bf16.msra.mxu1 %v629_v12 }
  0x2f   :  { %567 = vmatprep.subr.bf16.mxu1 %v698_v0  ;;  %582 = vmatpush3.bf16.msra.mxu0 %v635_v18 }
  0x30   :  { %583 = vmatprep.subr.bf16.mxu0 %v698_v0 }
  0x32   :  { %568 = vmatpush3.bf16.msra.mxu1 %v630_v13 }
  0x33   :  { %593 = vmatprep.subr.bf16.mxu1 %v698_v0  ;;  %584 = vmatpush3.bf16.msra.mxu0 %v636_v19 }
  0x34   :  { %585 = vmatprep.subr.bf16.mxu0 %v698_v0 }
  0x37   :  { %586 = vmatpush3.bf16.msra.mxu0 %v637_v30 }
  0x38   :  { %587 = vmatprep.subr.bf16.mxu0 %v698_v0 }
  0x3b   :  { %588 = vmatpush3.bf16.msra.mxu0 %v638_v31 }
  0xf0   :  { %v112_v21 = vpop.f32.mrb[0].mxu0 }
  0xf1   :  { %v113_v22 = vadd.f32 %v484_v20, %v112_v21  ;;  %v551_v23 = vpop.f32.mrb[1].mxu0 }
  0xf2   :  { %v115_v24 = vpop.f32.mrb[2].mxu0 }
  0xf3   :  { %v116_v25 = vadd.f32 %v484_v20, %v115_v24  ;;  %v552_v26 = vpop.f32.mrb[3].mxu0  ;;  %v119_v27 = vmax.f32 %v113_v22, 0.0 }
  0xf5   :  { %v120_v28 = vmax.f32 %v116_v25, 0.0 }
  0xf7   :  { %v121_v29 = vpack.c.bf16 %v120_v28, %v119_v27 }
  0xf9   :  { %570 = vmatmul.mubr.bf16.vlgmr.msra.gmra.mrb[0].mxu1 %v121_v29 }
  0xfa   :  { %609 = vmatprep.mubr.msk.bf16.mxu1 %vm699_vm0, %v698_v0  ;;  %594 = vmatpush3.bf16.msra.mxu1 %v639_v32 }
  0xfb   :  { %595 = vmatprep.subr.bf16.mxu1 %v698_v0 }
  0xfe   :  { %596 = vmatpush3.bf16.msra.mxu1 %v640_v33 }
  0xff   :  { %597 = vmatprep.subr.bf16.mxu1 %v698_v0 }
 0x102   :  { %598 = vmatpush3.bf16.msra.mxu1 %v641_v34 }
 0x103   :  { %599 = vmatprep.subr.bf16.mxu1 %v698_v0 }
 0x106   :  { %600 = vmatpush3.bf16.msra.mxu1 %v642_v35 }
 0x107   :  { %601 = vmatprep.subr.bf16.mxu1 %v698_v0 }
 0x10a   :  { %602 = vmatpush3.bf16.msra.mxu1 %v643_v36 }
 0x10b   :  { %603 = vmatprep.subr.bf16.mxu1 %v698_v0 }
 0x10e   :  { %604 = vmatpush3.bf16.msra.mxu1 %v644_v37 }
 0x10f   :  { %605 = vmatprep.subr.bf16.mxu1 %v698_v0 }
 0x112   :  { %606 = vmatpush3.bf16.msra.mxu1 %v645_v48 }
 0x113   :  { %607 = vmatprep.subr.bf16.mxu1 %v698_v0 }
 0x116   :  { %608 = vmatpush3.bf16.msra.mxu1 %v646_v49 }
 0x1cc   :  { %v227_v39 = vpop.f32.mrb[0].mxu1 }
 0x1cd   :  { %v228_v40 = vadd.f32 %v488_v38, %v227_v39  ;;  %v571_v41 = vpop.f32.mrb[1].mxu1 }
 0x1ce   :  { %v230_v42 = vpop.f32.mrb[2].mxu1 }
 0x1cf   :  { %v231_v43 = vadd.f32 %v488_v38, %v230_v42  ;;  %v572_v44 = vpop.f32.mrb[3].mxu1  ;;  %v234_v45 = vmax.f32 %v228_v40, 0.0 }
 0x1d1   :  { %v235_v46 = vmax.f32 %v231_v43, 0.0 }
 0x1d3   :  { %v236_v47 = vpack.c.bf16 %v235_v46, %v234_v45 }
 0x1d5   :  { %590 = vmatmul.mubr.bf16.vlgmr.msra.gmra.mrb[4].mxu0 %v236_v47 }
 0x2a8   :  { %v342_v51 = vpop.f32.mrb[4].mxu0 }
 0x2a9   :  { %v343_v52 = vadd.f32 %v497_v50, %v342_v51  ;;  %v591_v53 = vpop.f32.mrb[5].mxu0 }
 0x2aa   :  { %v345_v54 = vpop.f32.mrb[6].mxu0 }
 0x2ab   :  { %v346_v55 = vadd.f32 %v497_v50, %v345_v54  ;;  %v592_v56 = vpop.f32.mrb[7].mxu0  ;;  %v349_v57 = vmax.f32 %v343_v52, 0.0 }
 0x2ad   :  { %v350_v58 = vmax.f32 %v346_v55, 0.0 }
 0x2af   :  { %v351_v59 = vpack.c.bf16 %v350_v58, %v349_v57 }
 0x2b1   :  { %610 = vmatmul.mubr.bf16.vlgmr.msra.gmra.mrb[4].mxu1 %v351_v59 }
 0x384   :  { %v457_v61 = vpop.f32.mrb[4].mxu1 }
 0x385   :  { %v458_v62 = vadd.f32 %v506_v60, %v457_v61  ;;  %v611_v63 = vpop.f32.mrb[5].mxu1 }
 0x386   :  { %v460_v0 = vpop.f32.mrb[6].mxu1 }
 0x387   :  { %465 = vst.msk [vmem:[#allocation5] sm:$0xff] %vm464_vm2, %v458_v62  ;;  %v461_v1 = vadd.f32 %v506_v60, %v460_v0  ;;  %v612_v2 = vpop.f32.mrb[7].mxu1 }
 0x389   :  { %466 = vst.msk [vmem:[#allocation5 + $0x8] sm:$0xff] %vm464_vm2, %v461_v1 }
 0x38a   :  { %680 = shalt.err (!%p677_p12)
}
 0x38b   :  { %s681_s22 = scalar_lea.hbm %s892_s9, 256 }
 0x38c   :  { %p682_p13 = scmp.ne.s32.totalorder %s892_s9, %s681_s22  ;;  %p685_p0 = scmp.lt.u32.totalorder %s681_s22, %s892_s9 }
 0x38e   :  { %p687_p1 = pnand %p685_p0, %p682_p13 }
 0x390   :  { %690 = shalt.err (!%p687_p1)
}
 0x391   :  { %s701_s25 = smov 128   ;;  %s702_s5 = smov 8  }
 0x392   :  { %478 = dma.vmem_to_hbm [thread:$0]  %s473_s20, 256, %s892_s9, [#allocation4], %s701_s25, %s701_s25, %s702_s5  }
 0x393   :  { %693 = dma.done.wait [#allocation4], 256  }
 0x394   :  { %694 = vsyncadd [#allocation4], 4294967040 }
 0x395   :  { %482 = vsyncpa [#allocation3], 1 }
 0x396   :  { %483 = vsyncpa [#allocation4], 1 }

</bundles_post_ra>
